<compile_context>
chip_gen: v7x
topology: tpu7x:2x2x1
jax: 0.10.0
libtpu: 0.0.40
codegen_flags: <defaults>
</compile_context>

<pallas_src>
import functools

import jax
import jax.numpy as jnp
from jax.experimental import pallas as pl
from jax.experimental.pallas import tpu as pltpu

_LANE = 128
_SUBLANES = 8


def _detect_num_tensorcores():
    """Best-effort per-chip TensorCore count (2 on v7x, 1 on v5e/v6e)."""
    try:
        info = pltpu.get_tpu_info()
    except Exception:
        return 1
    for name in ("num_tensorcores", "tensorcores_per_chip", "num_tensor_cores"):
        v = getattr(info, name, None)
        if isinstance(v, int) and v >= 1:
            return min(v, 2)
    return 1


def _sigmoid_f32(x):
    # exp + reciprocal both land on the EUP slot (otherwise idle here).
    return pl.reciprocal(1.0 + jnp.exp(-x))


def _dice_kernel(x_ref, t_ref, out_ref, acc_num_ref, acc_den_ref, *, rows_kernel):
    """One (block_rows, 128) tile: sigmoid + partial sums into (8,128) f32 accs.

    out_ref: SMEM (1, 2) block -> [intersection, sum(p) + sum(t)] per split,
    written only on the last inner grid step.
    """
    k = pl.program_id(1)

    @pl.when(k == 0)
    def _():
        acc_num_ref[...] = jnp.zeros_like(acc_num_ref)
        acc_den_ref[...] = jnp.zeros_like(acc_den_ref)

    block_rows, lanes = x_ref.shape
    groups = block_rows // _SUBLANES

    # Logical (unclamped) position of this tile in the flattened (rows, 128)
    # view.  Tiles whose rows all lie below rows_kernel are fully valid.
    logical_block = pl.program_id(0) * pl.num_programs(1) + k
    row0 = logical_block * block_rows
    interior = (row0 + block_rows) <= rows_kernel

    def accumulate(p, t):
        # Group-of-8-sublane fold: pure VALU chain adds into one vreg each.
        acc_num_ref[...] += (p * t).reshape(groups, _SUBLANES, lanes).sum(axis=0)
        acc_den_ref[...] += (p + t).reshape(groups, _SUBLANES, lanes).sum(axis=0)

    @pl.when(interior)
    def _():
        p = _sigmoid_f32(x_ref[...].astype(jnp.float32))
        t = t_ref[...].astype(jnp.float32)
        accumulate(p, t)

    @pl.when(jnp.logical_not(interior))
    def _():
        # Cold path: boundary (partial edge block) or clamped-duplicate tile.
        # rows_kernel is a whole number of 128-lane rows, so one row compare
        # is enough; jnp.where also neutralizes any unspecified overhang data.
        row = row0 + jax.lax.broadcasted_iota(jnp.int32, (block_rows, lanes), 0)
        valid = row < rows_kernel
        p = jnp.where(valid, _sigmoid_f32(x_ref[...].astype(jnp.float32)), 0.0)
        t = jnp.where(valid, t_ref[...].astype(jnp.float32), 0.0)
        accumulate(p, t)

    @pl.when(k == pl.num_programs(1) - 1)
    def _():
        out_ref[0, 0] = jnp.sum(acc_num_ref[...])
        out_ref[0, 1] = jnp.sum(acc_den_ref[...])


def dice_loss(inputs, targets, smooth=1.0, *, max_block_rows=None,
              num_splits=None, core_parallel=None):
    """Pallas implementation of DiceLoss.forward (sigmoid + global dice)."""
    n = int(inputs.size)
    x1d = inputs.reshape(-1)
    t1d = targets.reshape(-1)

    # The kernel streams whole (8,128) tiles; the (<1024 element) remainder is
    # folded in by the JAX epilogue below (no jnp.pad full-stream copy).
    rows_kernel = (n // (_SUBLANES * _LANE)) * _SUBLANES
    n_kernel = rows_kernel * _LANE

    intersection = jnp.float32(0.0)
    denom = jnp.float32(0.0)

    if rows_kernel > 0:
        if n_kernel == n:
            xb, tb = x1d, t1d                       # free bitcast reshapes
        else:
            xb = jax.lax.slice(x1d, (0,), (n_kernel,))
            tb = jax.lax.slice(t1d, (0,), (n_kernel,))
        xb = xb.reshape(rows_kernel, _LANE)
        tb = tb.reshape(rows_kernel, _LANE)

        # ~2 MiB per input stream per grid step (4096 rows f32 / 8192 bf16).
        if max_block_rows is None:
            itemsize = max(jnp.dtype(xb.dtype).itemsize,
                           jnp.dtype(tb.dtype).itemsize)
            max_block_rows = max(_SUBLANES, (2 * 1024 * 1024) // (_LANE * itemsize))
        block_rows = (int(max_block_rows) // _SUBLANES) * _SUBLANES
        block_rows = max(_SUBLANES, min(block_rows, rows_kernel))
        blocks_total = pl.cdiv(rows_kernel, block_rows)

        n_cores = _detect_num_tensorcores()
        if num_splits is None:
            num_splits = n_cores                    # 1 on v5e/v6e, 2 on v7x
        nsplit = max(1, min(int(num_splits), blocks_total))
        bps = pl.cdiv(blocks_total, nsplit)         # blocks per split
        if core_parallel is None:
            core_parallel = (nsplit > 1) and (nsplit == n_cores)
        lead_sem = pltpu.CORE_PARALLEL if (core_parallel and nsplit > 1) \
            else pltpu.ARBITRARY
        dims = (lead_sem, pltpu.ARBITRARY)

        # Clamp the block index so splits never issue a fully out-of-bounds
        # DMA; clamped-duplicate tiles take the masked path and contribute 0.
        in_spec = pl.BlockSpec(
            (block_rows, _LANE),
            lambda s, k: (jnp.minimum(s * bps + k, blocks_total - 1), 0))

        partials = pl.pallas_call(
            functools.partial(_dice_kernel, rows_kernel=rows_kernel),
            out_shape=jax.ShapeDtypeStruct((nsplit, 2), jnp.float32),
            grid=(nsplit, bps),
            in_specs=[in_spec, in_spec],
            out_specs=pl.BlockSpec((1, 2), lambda s, k: (s, 0),
                                   memory_space=pltpu.MemorySpace.SMEM),
            scratch_shapes=[pltpu.VMEM((_SUBLANES, _LANE), jnp.float32),
                            pltpu.VMEM((_SUBLANES, _LANE), jnp.float32)],
            compiler_params=pltpu.CompilerParams(
                dimension_semantics=dims,
                vmem_limit_bytes=32 * 1024 * 1024),
        )(xb, tb)

        intersection = jnp.sum(partials[:, 0])
        denom = jnp.sum(partials[:, 1])

    if n_kernel != n:
        # Tiny tail (< 1024 elements): plain JAX, negligible cost.
        x_tail = jax.lax.slice(x1d, (n_kernel,), (n,)).astype(jnp.float32)
        t_tail = jax.lax.slice(t1d, (n_kernel,), (n,)).astype(jnp.float32)
        p_tail = 1.0 / (1.0 + jnp.exp(-x_tail))
        intersection = intersection + jnp.sum(p_tail * t_tail)
        denom = denom + jnp.sum(p_tail) + jnp.sum(t_tail)

    dice = (2.0 * intersection + smooth) / (denom + smooth)
    return 1.0 - dice


def _dice_loss_ref(inputs, targets, smooth=1.0):
    p = jax.nn.sigmoid(inputs.reshape(-1).astype(jnp.float32))
    t = targets.reshape(-1).astype(jnp.float32)
    inter = jnp.sum(p * t)
    return 1.0 - (2.0 * inter + smooth) / (jnp.sum(p) + jnp.sum(t) + smooth)


if __name__ == "__main__":
    key = jax.random.PRNGKey(0)
    k1, k2, k3, k4, k5, k6 = jax.random.split(key, 6)

    # Case 1: canonical small NCHW logits / binary mask (n = 2048, single tile).
    x1 = jax.random.normal(k1, (2, 4, 16, 16), dtype=jnp.float32)
    y1 = (jax.random.uniform(k2, (2, 4, 16, 16)) > 0.5).astype(jnp.float32)
    out1 = jax.block_until_ready(dice_loss(x1, y1, smooth=1.0))
    ref1 = jax.block_until_ready(_dice_loss_ref(x1, y1, smooth=1.0))
    assert jnp.allclose(out1, ref1, rtol=1e-5, atol=1e-5), (out1, ref1)

    # Case 2: force a 2-way split with tiny blocks (rows=24, block_rows=16) to
    # exercise the fast interior path, the masked overhang tile and the split
    # combine (runs with "arbitrary" semantics unless 2 TensorCores detected).
    x2 = jax.random.normal(k3, (3, 1, 32, 32), dtype=jnp.float32)
    y2 = (jax.random.uniform(k4, (3, 1, 32, 32)) > 0.5).astype(jnp.float32)
    out2 = jax.block_until_ready(
        dice_loss(x2, y2, smooth=1.0, max_block_rows=16, num_splits=2))
    ref2 = jax.block_until_ready(_dice_loss_ref(x2, y2, smooth=1.0))
    assert jnp.allclose(out2, ref2, rtol=1e-5, atol=1e-5), (out2, ref2)

    # Case 3: ragged element count (n = 1197): bulk tile through the kernel
    # with native bf16 logits, <1024-element tail folded in by the epilogue.
    x3 = jax.random.normal(k5, (3, 1, 21, 19), dtype=jnp.bfloat16)
    y3 = (jax.random.uniform(k6, (3, 1, 21, 19)) > 0.5).astype(jnp.float32)
    out3 = jax.block_until_ready(dice_loss(x3, y3, smooth=1.0))
    ref3 = jax.block_until_ready(_dice_loss_ref(x3, y3, smooth=1.0))
    assert jnp.allclose(out3, ref3, rtol=1e-4, atol=1e-4), (out3, ref3)

    print("KERNEL_OK")
</pallas_src>

<mosaic_0001>
module attributes {stable_mosaic.version = 11 : i64} {
  func.func @_dice_kernel(%arg0: i32, %arg1: i32, %arg2: memref<16x128xf32, #tpu.memory_space<vmem>>, %arg3: memref<16x128xf32, #tpu.memory_space<vmem>>, %arg4: memref<1x2xf32, #tpu.memory_space<smem>>, %arg5: memref<8x128xf32, #tpu.memory_space<vmem>>, %arg6: memref<8x128xf32, #tpu.memory_space<vmem>>) attributes {dimension_semantics = [#tpu.dimension_semantics<arbitrary>, #tpu.dimension_semantics<arbitrary>], iteration_bounds = array<i64: 1, 1>, scalar_prefetch = 0 : i64, scratch_operands = 2 : i64, tpu.core_type = #tpu.core_type<tc>, window_params = [{transform_indices = @transform_0, window_bounds = array<i64: 16, 128>}, {transform_indices = @transform_1, window_bounds = array<i64: 16, 128>}, {transform_indices = @transform_2, window_bounds = array<i64: 1, 2>}]} {
    %c0_i32 = arith.constant 0 : i32
    %0 = arith.cmpi eq, %arg1, %c0_i32 : i32
    %1 = arith.extui %0 : i1 to i32
    %c0_i32_0 = arith.constant 0 : i32
    %2 = arith.cmpi ne, %1, %c0_i32_0 : i32
    scf.if %2 {
      %cst = arith.constant 0.000000e+00 : f32
      %16 = vector.broadcast %cst : f32 to vector<8x128xf32>
      %c0 = arith.constant 0 : index
      %c0_7 = arith.constant 0 : index
      %17 = vector.load %arg5[%c0, %c0_7] : memref<8x128xf32, #tpu.memory_space<vmem>>, vector<8x128xf32>
      tpu.vector_store %arg5[%c0, %c0_7], %16 {strides = array<i32>} : memref<8x128xf32, #tpu.memory_space<vmem>>, vector<8x128xf32>,
      %cst_8 = arith.constant 0.000000e+00 : f32
      %18 = vector.broadcast %cst_8 : f32 to vector<8x128xf32>
      %c0_9 = arith.constant 0 : index
      %c0_10 = arith.constant 0 : index
      %19 = vector.load %arg6[%c0_9, %c0_10] : memref<8x128xf32, #tpu.memory_space<vmem>>, vector<8x128xf32>
      tpu.vector_store %arg6[%c0_9, %c0_10], %18 {strides = array<i32>} : memref<8x128xf32, #tpu.memory_space<vmem>>, vector<8x128xf32>,
    } else {
    }
    %c1_i32 = arith.constant 1 : i32
    %3 = arith.muli %arg0, %c1_i32 : i32
    %4 = arith.addi %3, %arg1 : i32
    %c16_i32 = arith.constant 16 : i32
    %5 = arith.muli %4, %c16_i32 : i32
    %c16_i32_1 = arith.constant 16 : i32
    %6 = arith.addi %5, %c16_i32_1 : i32
    %c16_i32_2 = arith.constant 16 : i32
    %7 = arith.cmpi sle, %6, %c16_i32_2 : i32
    %8 = arith.extui %7 : i1 to i32
    %c0_i32_3 = arith.constant 0 : i32
    %9 = arith.cmpi ne, %8, %c0_i32_3 : i32
    scf.if %9 {
      %c0 = arith.constant 0 : index
      %c0_7 = arith.constant 0 : index
      %16 = vector.load %arg2[%c0, %c0_7] : memref<16x128xf32, #tpu.memory_space<vmem>>, vector<16x128xf32>
      %cst = arith.constant 0.000000e+00 : f32
      %17 = vector.broadcast %cst : f32 to vector<16x128xf32>
      %18 = arith.subf %17, %16 : vector<16x128xf32>
      %19 = math.exp %18 : vector<16x128xf32>
      %cst_8 = arith.constant 1.000000e+00 : f32
      %20 = vector.broadcast %cst_8 : f32 to vector<16x128xf32>
      %21 = arith.addf %20, %19 : vector<16x128xf32>
      %22 = tpu.reciprocal %21 : vector<16x128xf32> -> vector<16x128xf32>
      %c0_9 = arith.constant 0 : index
      %c0_10 = arith.constant 0 : index
      %23 = vector.load %arg3[%c0_9, %c0_10] : memref<16x128xf32, #tpu.memory_space<vmem>>, vector<16x128xf32>
      %c0_11 = arith.constant 0 : index
      %c0_12 = arith.constant 0 : index
      %24 = vector.load %arg5[%c0_11, %c0_12] : memref<8x128xf32, #tpu.memory_space<vmem>>, vector<8x128xf32>
      %25 = arith.mulf %22, %23 : vector<16x128xf32>
      %26 = vector.shape_cast %25 : vector<16x128xf32> to vector<2x8x128xf32>
      %cst_13 = arith.constant dense<0.000000e+00> : vector<8x128xf32>
      %27 = vector.multi_reduction <add>, %26, %cst_13 [0] : vector<2x8x128xf32> to vector<8x128xf32>
      %28 = arith.addf %24, %27 : vector<8x128xf32>
      %c0_14 = arith.constant 0 : index
      %c0_15 = arith.constant 0 : index
      %29 = vector.load %arg5[%c0_14, %c0_15] : memref<8x128xf32, #tpu.memory_space<vmem>>, vector<8x128xf32>
      tpu.vector_store %arg5[%c0_14, %c0_15], %28 {strides = array<i32>} : memref<8x128xf32, #tpu.memory_space<vmem>>, vector<8x128xf32>,
      %c0_16 = arith.constant 0 : index
      %c0_17 = arith.constant 0 : index
      %30 = vector.load %arg6[%c0_16, %c0_17] : memref<8x128xf32, #tpu.memory_space<vmem>>, vector<8x128xf32>
      %31 = arith.addf %22, %23 : vector<16x128xf32>
      %32 = vector.shape_cast %31 : vector<16x128xf32> to vector<2x8x128xf32>
      %cst_18 = arith.constant dense<0.000000e+00> : vector<8x128xf32>
      %33 = vector.multi_reduction <add>, %32, %cst_18 [0] : vector<2x8x128xf32> to vector<8x128xf32>
      %34 = arith.addf %30, %33 : vector<8x128xf32>
      %c0_19 = arith.constant 0 : index
      %c0_20 = arith.constant 0 : index
      %35 = vector.load %arg6[%c0_19, %c0_20] : memref<8x128xf32, #tpu.memory_space<vmem>>, vector<8x128xf32>
      tpu.vector_store %arg6[%c0_19, %c0_20], %34 {strides = array<i32>} : memref<8x128xf32, #tpu.memory_space<vmem>>, vector<8x128xf32>,
    } else {
    }
    %true = arith.constant true
    %10 = arith.xori %7, %true : i1
    %11 = arith.extui %10 : i1 to i32
    %c0_i32_4 = arith.constant 0 : i32
    %12 = arith.cmpi ne, %11, %c0_i32_4 : i32
    scf.if %12 {
      %16 = tpu.iota {dimensions = array<i32: 0>} : vector<16x128xi32>
      %17 = vector.broadcast %5 : i32 to vector<16x128xi32>
      %18 = arith.addi %17, %16 : vector<16x128xi32>
      %c16_i32_7 = arith.constant 16 : i32
      %19 = vector.broadcast %c16_i32_7 : i32 to vector<16x128xi32>
      %20 = arith.cmpi slt, %18, %19 : vector<16x128xi32>
      %c0 = arith.constant 0 : index
      %c0_8 = arith.constant 0 : index
      %21 = vector.load %arg2[%c0, %c0_8] : memref<16x128xf32, #tpu.memory_space<vmem>>, vector<16x128xf32>
      %cst = arith.constant 0.000000e+00 : f32
      %22 = vector.broadcast %cst : f32 to vector<16x128xf32>
      %23 = arith.subf %22, %21 : vector<16x128xf32>
      %24 = math.exp %23 : vector<16x128xf32>
      %cst_9 = arith.constant 1.000000e+00 : f32
      %25 = vector.broadcast %cst_9 : f32 to vector<16x128xf32>
      %26 = arith.addf %25, %24 : vector<16x128xf32>
      %27 = tpu.reciprocal %26 : vector<16x128xf32> -> vector<16x128xf32>
      %cst_10 = arith.constant 0.000000e+00 : f32
      %28 = vector.broadcast %cst_10 : f32 to vector<16x128xf32>
      %29 = arith.select %20, %27, %28 : vector<16x128xi1>, vector<16x128xf32>
      %c0_11 = arith.constant 0 : index
      %c0_12 = arith.constant 0 : index
      %30 = vector.load %arg3[%c0_11, %c0_12] : memref<16x128xf32, #tpu.memory_space<vmem>>, vector<16x128xf32>
      %cst_13 = arith.constant 0.000000e+00 : f32
      %31 = vector.broadcast %cst_13 : f32 to vector<16x128xf32>
      %32 = arith.select %20, %30, %31 : vector<16x128xi1>, vector<16x128xf32>
      %c0_14 = arith.constant 0 : index
      %c0_15 = arith.constant 0 : index
      %33 = vector.load %arg5[%c0_14, %c0_15] : memref<8x128xf32, #tpu.memory_space<vmem>>, vector<8x128xf32>
      %34 = arith.mulf %29, %32 : vector<16x128xf32>
      %35 = vector.shape_cast %34 : vector<16x128xf32> to vector<2x8x128xf32>
      %cst_16 = arith.constant dense<0.000000e+00> : vector<8x128xf32>
      %36 = vector.multi_reduction <add>, %35, %cst_16 [0] : vector<2x8x128xf32> to vector<8x128xf32>
      %37 = arith.addf %33, %36 : vector<8x128xf32>
      %c0_17 = arith.constant 0 : index
      %c0_18 = arith.constant 0 : index
      %38 = vector.load %arg5[%c0_17, %c0_18] : memref<8x128xf32, #tpu.memory_space<vmem>>, vector<8x128xf32>
      tpu.vector_store %arg5[%c0_17, %c0_18], %37 {strides = array<i32>} : memref<8x128xf32, #tpu.memory_space<vmem>>, vector<8x128xf32>,
      %c0_19 = arith.constant 0 : index
      %c0_20 = arith.constant 0 : index
      %39 = vector.load %arg6[%c0_19, %c0_20] : memref<8x128xf32, #tpu.memory_space<vmem>>, vector<8x128xf32>
      %40 = arith.addf %29, %32 : vector<16x128xf32>
      %41 = vector.shape_cast %40 : vector<16x128xf32> to vector<2x8x128xf32>
      %cst_21 = arith.constant dense<0.000000e+00> : vector<8x128xf32>
      %42 = vector.multi_reduction <add>, %41, %cst_21 [0] : vector<2x8x128xf32> to vector<8x128xf32>
      %43 = arith.addf %39, %42 : vector<8x128xf32>
      %c0_22 = arith.constant 0 : index
      %c0_23 = arith.constant 0 : index
      %44 = vector.load %arg6[%c0_22, %c0_23] : memref<8x128xf32, #tpu.memory_space<vmem>>, vector<8x128xf32>
      tpu.vector_store %arg6[%c0_22, %c0_23], %43 {strides = array<i32>} : memref<8x128xf32, #tpu.memory_space<vmem>>, vector<8x128xf32>,
    } else {
    }
    %c0_i32_5 = arith.constant 0 : i32
    %13 = arith.cmpi eq, %arg1, %c0_i32_5 : i32
    %14 = arith.extui %13 : i1 to i32
    %c0_i32_6 = arith.constant 0 : i32
    %15 = arith.cmpi ne, %14, %c0_i32_6 : i32
    scf.if %15 {
      %c0 = arith.constant 0 : index
      %c0_7 = arith.constant 0 : index
      %16 = vector.load %arg5[%c0, %c0_7] : memref<8x128xf32, #tpu.memory_space<vmem>>, vector<8x128xf32>
      %17 = vector.shape_cast %16 : vector<8x128xf32> to vector<1x8x128xf32>
      %cst = arith.constant dense<0.000000e+00> : vector<1xf32>
      %18 = vector.multi_reduction <add>, %17, %cst [1, 2] : vector<1x8x128xf32> to vector<1xf32>
      %19 = vector.shape_cast %18 : vector<1xf32> to vector<1x1x1xf32>
      %20 = vector.extract %19[0, 0, 0] : f32 from vector<1x1x1xf32>
      %c0_8 = arith.constant 0 : index
      %c0_9 = arith.constant 0 : index
      %21 = memref.load %arg4[%c0_8, %c0_9] : memref<1x2xf32, #tpu.memory_space<smem>>
      memref.store %20, %arg4[%c0_8, %c0_9] : memref<1x2xf32, #tpu.memory_space<smem>>
      %c0_10 = arith.constant 0 : index
      %c0_11 = arith.constant 0 : index
      %22 = vector.load %arg6[%c0_10, %c0_11] : memref<8x128xf32, #tpu.memory_space<vmem>>, vector<8x128xf32>
      %23 = vector.shape_cast %22 : vector<8x128xf32> to vector<1x8x128xf32>
      %cst_12 = arith.constant dense<0.000000e+00> : vector<1xf32>
      %24 = vector.multi_reduction <add>, %23, %cst_12 [1, 2] : vector<1x8x128xf32> to vector<1xf32>
      %25 = vector.shape_cast %24 : vector<1xf32> to vector<1x1x1xf32>
      %26 = vector.extract %25[0, 0, 0] : f32 from vector<1x1x1xf32>
      %c0_13 = arith.constant 0 : index
      %c1 = arith.constant 1 : index
      %27 = memref.load %arg4[%c0_13, %c1] : memref<1x2xf32, #tpu.memory_space<smem>>
      memref.store %26, %arg4[%c0_13, %c1] : memref<1x2xf32, #tpu.memory_space<smem>>
    } else {
    }
    return
  }
  func.func @transform_0(%arg0: i32, %arg1: i32) -> (i32, i32) {
    %c1_i32 = arith.constant 1 : i32
    %0 = arith.muli %arg0, %c1_i32 : i32
    %1 = arith.addi %0, %arg1 : i32
    %c0_i32 = arith.constant 0 : i32
    %2 = arith.minsi %1, %c0_i32 : i32
    %c0_i32_0 = arith.constant 0 : i32
    %c0_i32_1 = arith.constant 0 : i32
    return %2, %c0_i32_0 : i32, i32
  }
  func.func @transform_1(%arg0: i32, %arg1: i32) -> (i32, i32) {
    %c1_i32 = arith.constant 1 : i32
    %0 = arith.muli %arg0, %c1_i32 : i32
    %1 = arith.addi %0, %arg1 : i32
    %c0_i32 = arith.constant 0 : i32
    %2 = arith.minsi %1, %c0_i32 : i32
    %c0_i32_0 = arith.constant 0 : i32
    %c0_i32_1 = arith.constant 0 : i32
    return %2, %c0_i32_0 : i32, i32
  }
  func.func @transform_2(%arg0: i32, %arg1: i32) -> (i32, i32) {
    %c0_i32 = arith.constant 0 : i32
    %c0_i32_0 = arith.constant 0 : i32
    return %arg0, %c0_i32 : i32, i32
  }
}

</mosaic_0001>

<bundles_post_ra>
// kernel: tpu_custom_call.1
= control target key start
LH: loop header
LB: loop body
LE: loop exit
PB: predicated region body
PF: predicated region fallthrough
CT: control target
= control target key end

     0   :  { %7 = vsyncpa [#allocation5], 0  ;;  %s320_s0 = inlined_call_operand.hbm [shape: f32[16,128], index: 0, kind: input, shape index: {}]   ;;  %s321_s1 = inlined_call_operand.hbm [shape: f32[16,128], index: 1, kind: input, shape index: {}]   ;;  %s322_s2 = inlined_call_operand.hbm [shape: f32[1,2], index: 2, kind: output, shape index: {}]  }
   0x1   :  { %8 = vsyncpa [#allocation8], 0 }
   0x2   :  { %9 = vsyncpa [#allocation6], 0  ;;  %s264_s9 = smov [#allocation4]   ;;  %s204_s13 = scalar_lea.hbm %s320_s0, 256 }
   0x3   :  { %s21_s10 = sshll.u32 %s264_s9, 4  ;;  %p205_p0 = scmp.ne.s32.totalorder %s320_s0, %s204_s13  ;;  %s22_s10 = int_to_ptr.vmem [resolvable:$true] %s21_s10 }
   0x4   :  { %p208_p1 = scmp.lt.u32.totalorder %s204_s13, %s320_s0 }
   0x6   :  { %p210_p2 = pnand %p208_p1, %p205_p0 }
   0x8   :  { %213 = shalt.err (!%p210_p2)
}
   0x9   :  { %s214_s18 = scalar_lea.vmem %s22_s10, 256  ;;  %p219_p4 = scmp.lt.s32.totalorder %s22_s10, %s22_s10 }
   0xa   :  { %p215_p3 = scmp.ne.s32.totalorder %s22_s10, %s214_s18  ;;  %p220_p5 = scmp.lt.s32.totalorder %s214_s18, %s214_s18 }
   0xc   :  { %p221_p6 = por %p220_p5, %p219_p4 }
   0xe   :  { %p222_p7 = pnand %p221_p6, %p215_p3 }
  0x10   :  { %225 = shalt.err (!%p222_p7)
}
  0x11   :  { %s265_s19 = smov 128   ;;  %s266_s20 = smov 8  }
  0x12   :  { %27 = dma.hbm_to_vmem [thread:$0]  %s320_s0, 256, %s22_s10, [#allocation5], %s265_s19, %s265_s19, %s266_s20  }
  0x13   :  { %s267_s23 = smov [#allocation7]   ;;  %s226_s27 = scalar_lea.hbm %s321_s1, 256 }
  0x14   :  { %s39_s24 = sshll.u32 %s267_s23, 4  ;;  %p227_p8 = scmp.ne.s32.totalorder %s321_s1, %s226_s27  ;;  %s40_s24 = int_to_ptr.vmem [resolvable:$true] %s39_s24 }
  0x15   :  { %p230_p9 = scmp.lt.u32.totalorder %s226_s27, %s321_s1 }
  0x17   :  { %p232_p10 = pnand %p230_p9, %p227_p8 }
  0x19   :  { %235 = shalt.err (!%p232_p10)
}
  0x1a   :  { %s236_s4 = scalar_lea.vmem %s40_s24, 256  ;;  %p241_p12 = scmp.lt.s32.totalorder %s40_s24, %s40_s24 }
  0x1b   :  { %p237_p11 = scmp.ne.s32.totalorder %s40_s24, %s236_s4  ;;  %p242_p13 = scmp.lt.s32.totalorder %s236_s4, %s236_s4 }
  0x1d   :  { %p243_p0 = por %p242_p13, %p241_p12 }
  0x1f   :  { %p244_p1 = pnand %p243_p0, %p237_p11 }
  0x21   :  { %247 = shalt.err (!%p244_p1)
}
  0x22   :  { %45 = dma.hbm_to_vmem [thread:$0]  %s321_s1, 256, %s40_s24, [#allocation8], %s265_s19, %s265_s19, %s266_s20  }
  0x23   :  { %258 = dma.done.wait [#allocation5], 256  }
  0x24   :  { %259 = vsyncadd [#allocation5], 4294967040 }
  0x25   :  { %260 = dma.done.wait [#allocation8], 256  }
  0x26   :  { %261 = vsyncadd [#allocation8], 4294967040  ;;  %v73_v0 = vld [vmem:[#allocation4] sm:$0xff]  ;;  %v74_v1 = vld [vmem:[#allocation4 + $0x8] sm:$0xff]  ;;  %s248_s9 = scalar_lea.hbm %s322_s2, 16 }
  0x27   :  { %v75_v2 = vsub.f32 0.0, %v73_v0  ;;  %v76_v3 = vsub.f32 0.0, %v74_v1  ;;  %v85_v10 = vld [vmem:[#allocation7] sm:$0xff]  ;;  %v86_v11 = vld [vmem:[#allocation7 + $0x8] sm:$0xff]  ;;  %p249_p2 = scmp.ne.s32.totalorder %s322_s2, %s248_s9  ;;  %p252_p3 = scmp.lt.u32.totalorder %s248_s9, %s322_s2 }
  0x29   :  { %v77_v4 = vmul.f32 1.442695, %v75_v2  ;;  %v79_v5 = vmul.f32 1.442695, %v76_v3  ;;  %p254_p4 = pnand %p252_p3, %p249_p2 }
  0x2b   :  { %196 = vpow2.f32 %v77_v4 }
  0x2c   :  { %198 = vpow2.f32 %v79_v5 }
  0x35   :  { %v197_v6 = vpop.eup %196 }
  0x36   :  { %v199_v7 = vpop.eup %198  ;;  %v81_v8 = vadd.f32 1.0, %v197_v6 }
  0x37   :  { %v82_v9 = vadd.f32 1.0, %v199_v7 }
  0x38   :  { %200 = vrcp.f32 %v81_v8 }
  0x39   :  { %202 = vrcp.f32 %v82_v9 }
  0x42   :  { %v201_v12 = vpop.eup %200 }
  0x43   :  { %v203_v13 = vpop.eup %202  ;;  %v88_v14 = vmul.f32 %v201_v12, %v85_v10  ;;  %v94_v16 = vadd.f32 %v201_v12, %v85_v10 }
  0x44   :  { %v89_v15 = vmul.f32 %v203_v13, %v86_v11  ;;  %v95_v17 = vadd.f32 %v203_v13, %v86_v11 }
  0x46   :  { %v90_v18 = vadd.f32 %v89_v15, %v88_v14  ;;  %v96_v19 = vadd.f32 %v95_v17, %v94_v16 }
  0x48   :  { %145 = vadd.xlane.f32.xlu0 %v90_v18 }
  0x4c   :  { %157 = vadd.xlane.f32.xlu0 %v96_v19 }
  0xd5   :  { %v146_v20 = vpop.xlane.xlu0 %145 }
  0xd6   :  { %v147_v21 = vrot.slane %v146_v20, 4 }
  0xd8   :  { %v148_v22 = vadd.f32 %v147_v21, %v146_v20 }
  0xd9   :  { %v158_v23 = vpop.xlane.xlu0 %157 }
  0xda   :  { %v149_v24 = vrot.slane %v148_v22, 2  ;;  %v159_v25 = vrot.slane %v158_v23, 4 }
  0xdc   :  { %v160_v26 = vadd.f32 %v159_v25, %v158_v23  ;;  %v150_v27 = vadd.f32 %v149_v24, %v148_v22 }
  0xde   :  { %v161_v28 = vrot.slane %v160_v26, 2  ;;  %v151_v29 = vrot.slane %v150_v27, 1 }
  0xe0   :  { %v162_v30 = vadd.f32 %v161_v28, %v160_v26  ;;  %v152_v31 = vadd.f32 %v151_v29, %v150_v27 }
  0xe2   :  { %187 = vpush %v152_v31  ;;  %v163_v32 = vrot.slane %v162_v30, 1 }
  0xe4   :  { %v164_v33 = vadd.f32 %v163_v32, %v162_v30 }
  0xe6   :  { %189 = vpush %v164_v33 }
 0x113   :  { %s188_s1 = spop %187 }
 0x114   :  { %155 = sst [smem:[#allocation9]] %s188_s1 }
 0x117   :  { %s190_s6 = spop %189 }
 0x118   :  { %167 = sst [smem:[#allocation9 + $0x1]] %s190_s6 }
 0x119   :  { %257 = shalt.err (!%p254_p4)
}
 0x11a   :  { %s268_s14 = smov [#allocation9]  }
 0x11b   :  { %175 = dma.smem_to_hbm %s268_s14, 16, %s322_s2, [#allocation6]  }
 0x11c   :  { %262 = dma.done.wait [#allocation6], 16  }
 0x11d   :  { %263 = vsyncadd [#allocation6], 4294967280 }
 0x11e   :  { %179 = sfence }
 0x11f   :  { %180 = vsyncpa [#allocation5], 1 }
 0x120   :  { %181 = vsyncpa [#allocation8], 1 }
 0x121   :  { %182 = vsyncpa [#allocation6], 1 }

</bundles_post_ra>
